<compile_context>
chip_gen: v7x
topology: tpu7x:2x2x1
jax: 0.10.0
libtpu: 0.0.40
codegen_flags: <defaults>
</compile_context>

<pallas_src>
import jax
import jax.numpy as jnp
from jax.experimental import pallas as pl
from jax.experimental.pallas import tpu as pltpu


def _round_up(x, m):
    return (x + m - 1) // m * m


def _tpu_defaults():
    """Generation-aware tile defaults + VMEM cap (conservative fallback)."""
    kind = ""
    try:
        kind = jax.devices()[0].device_kind.lower()
    except Exception:
        pass
    if "v7" in kind:
        # 3.2 TB/s HBM relaxes intensity target, but only 64 MiB VMEM/TC.
        return {"tm": 1024, "tn": 1024, "tk": 1024, "vmem_cap": 48 << 20}
    if "v6" in kind:
        # Highest compute:bandwidth ratio -> biggest tiles (128 MiB VMEM).
        return {"tm": 2048, "tn": 1024, "tk": 1024, "vmem_cap": 100 << 20}
    if "v5" in kind:
        return {"tm": 1024, "tn": 512, "tk": 1024, "vmem_cap": 100 << 20}
    # Unknown chip: tiles that fit every generation's VMEM.
    return {"tm": 1024, "tn": 512, "tk": 1024, "vmem_cap": 48 << 20}


def ffn_kernel(x_ref, w_ref, b_ref, o_ref, acc_ref):
    # x_ref: (tm, tk)   w_ref: (tk, tn)  [pre-transposed once at prep time]
    # b_ref: (1, tn) f32   o_ref: (tm, tn)   acc_ref: (tm, tn) f32 scratch
    k = pl.program_id(2)
    prod = jnp.dot(x_ref[...], w_ref[...], preferred_element_type=jnp.float32)

    @pl.when(k == 0)
    def _():
        acc_ref[...] = prod          # direct write: no zero-init / RMW pass

    @pl.when(k > 0)
    def _():
        acc_ref[...] += prod

    @pl.when(k == pl.num_programs(2) - 1)
    def _():
        h = acc_ref[...] + b_ref[...]   # f32 epilogue (bias broadcast)
        h = jnp.maximum(h, 0.0)         # activation_fn = ReLU (fused)
        o_ref[...] = h.astype(o_ref.dtype)


def prepare_ffn_params(weight, bias, *, compute_dtype=jnp.bfloat16,
                       tn=None, tk=None):
    """One-time weight/bias preparation (hoisted out of the per-call path).

    weight: [N, K] (PyTorch Linear layout), bias: [N].
    The weight is padded to 128-multiples, cast to compute_dtype and
    transposed ONCE to (K_pad, N_pad); the bias becomes (1, N_pad) f32.
    """
    defaults = _tpu_defaults()
    tn = defaults["tn"] if tn is None else tn
    tk = defaults["tk"] if tk is None else tk
    N, K = weight.shape

    tn_eff = min(_round_up(max(tn, 128), 128), _round_up(N, 128))
    tk_eff = min(_round_up(max(tk, 128), 128), _round_up(K, 128))
    N_pad = _round_up(N, tn_eff)
    K_pad = _round_up(K, tk_eff)

    w_kn = jnp.pad(weight.T.astype(compute_dtype),
                   ((0, K_pad - K), (0, N_pad - N)))
    b2d = jnp.pad(bias.astype(jnp.float32), (0, N_pad - N)).reshape(1, N_pad)

    return {"w_kn": w_kn, "b2d": b2d, "N": N, "K": K,
            "N_pad": N_pad, "K_pad": K_pad,
            "tn_eff": tn_eff, "tk_eff": tk_eff,
            "compute_dtype": compute_dtype,
            "tm_default": defaults["tm"], "vmem_cap": defaults["vmem_cap"]}


def feed_forward_layer(states, params, *, tm=None, out_dtype=None):
    """states: [..., K]; params: result of prepare_ffn_params()."""
    compute_dtype = params["compute_dtype"]
    K, N = params["K"], params["N"]
    K_pad, N_pad = params["K_pad"], params["N_pad"]
    tn_eff, tk_eff = params["tn_eff"], params["tk_eff"]
    out_dtype = states.dtype if out_dtype is None else out_dtype

    assert states.shape[-1] == K
    lead_shape = states.shape[:-1]
    M = 1
    for d in lead_shape:
        M *= d

    # bf16 packs 16 sublanes per vreg -> keep M tiles fully packed.
    row_gran = 16 if jnp.dtype(compute_dtype).itemsize == 2 else 8
    tm = params["tm_default"] if tm is None else tm
    tm_eff = min(_round_up(max(tm, row_gran), row_gran), _round_up(M, row_gran))
    M_pad = _round_up(M, tm_eff)

    # v7x megacore: if the parallel (M, N) tile grid would be 1x1, split M so
    # both TensorCores get work (no effect on single-TC v5e/v6e).
    if M_pad // tm_eff == 1 and N_pad // tn_eff == 1 and tm_eff >= 2 * row_gran:
        tm_eff = _round_up(tm_eff // 2, row_gran)
        M_pad = _round_up(M, tm_eff)

    x2d = states.reshape(M, K).astype(compute_dtype)
    if M_pad != M or K_pad != K:
        x2d = jnp.pad(x2d, ((0, M_pad - M), (0, K_pad - K)))

    grid = (M_pad // tm_eff, N_pad // tn_eff, K_pad // tk_eff)

    in_bytes = jnp.dtype(compute_dtype).itemsize
    out_bytes = jnp.dtype(out_dtype).itemsize
    vmem_needed = (2 * (tm_eff * tk_eff * in_bytes       # x (double-buffered)
                        + tk_eff * tn_eff * in_bytes     # w
                        + tm_eff * tn_eff * out_bytes    # out
                        + tn_eff * 4)                    # bias
                   + tm_eff * tn_eff * 4)                # f32 accumulator
    vmem_limit = min(params["vmem_cap"],
                     max(32 << 20, int(vmem_needed * 1.5) + (4 << 20)))

    out2d = pl.pallas_call(
        ffn_kernel,
        out_shape=jax.ShapeDtypeStruct((M_pad, N_pad), out_dtype),
        grid_spec=pltpu.PrefetchScalarGridSpec(
            num_scalar_prefetch=0,
            grid=grid,
            in_specs=[
                pl.BlockSpec((tm_eff, tk_eff), lambda i, j, k: (i, k)),  # x
                pl.BlockSpec((tk_eff, tn_eff), lambda i, j, k: (k, j)),  # W (K,N)
                pl.BlockSpec((1, tn_eff), lambda i, j, k: (0, j)),       # bias
            ],
            out_specs=pl.BlockSpec((tm_eff, tn_eff), lambda i, j, k: (i, j)),
            scratch_shapes=[pltpu.VMEM((tm_eff, tn_eff), jnp.float32)],
        ),
        compiler_params=pltpu.CompilerParams(
            dimension_semantics=("parallel", "parallel", "arbitrary"),
            vmem_limit_bytes=vmem_limit,
        ),
    )(x2d, params["w_kn"], params["b2d"])

    return out2d[:M, :N].reshape(*lead_shape, N)


def feed_forward(states, weight, bias, *, compute_dtype=jnp.bfloat16, **kwargs):
    """Convenience one-shot path. For repeated layer calls, prefer
    prepare_ffn_params() once + feed_forward_layer() per call."""
    params = prepare_ffn_params(weight, bias, compute_dtype=compute_dtype)
    return feed_forward_layer(states, params, **kwargs)


if __name__ == "__main__":
    # Small shapes implied by the module: batch=2, seq=8, input=32, output=32.
    batch, seq, input_size, output_size = 2, 8, 32, 32

    key = jax.random.PRNGKey(0)
    k_x, k_w, k_b = jax.random.split(key, 3)

    states = jax.random.normal(k_x, (batch, seq, input_size), dtype=jnp.float32)
    # PyTorch Linear layout: weight is [out_features, in_features].
    weight = jax.random.normal(k_w, (output_size, input_size), dtype=jnp.float32) * 0.1
    bias = jax.random.normal(k_b, (output_size,), dtype=jnp.float32) * 0.1

    # Weight prep hoisted out of the per-call path (done once per layer).
    params = prepare_ffn_params(weight, bias)
    out = feed_forward_layer(states, params)
    out = jax.block_until_ready(out)
    assert out.shape == (batch, seq, output_size)

    # Reference matching the kernel's compute dtype (bf16 operands, f32 acc).
    x_bf = states.astype(jnp.bfloat16)
    w_bf = weight.astype(jnp.bfloat16)
    ref_bf = jnp.einsum("bsk,nk->bsn", x_bf, w_bf,
                        preferred_element_type=jnp.float32) + bias
    ref_bf = jnp.maximum(ref_bf, 0.0)
    assert jnp.allclose(out, ref_bf, atol=2e-2, rtol=2e-2)

    # Looser check against the pure-f32 reference (Linear + ReLU, eval dropout).
    ref_f32 = jnp.maximum(jnp.einsum("bsk,nk->bsn", states, weight) + bias, 0.0)
    assert jnp.allclose(out, ref_f32, atol=5e-2, rtol=5e-2)

    print("KERNEL_OK")
</pallas_src>

<mosaic_0001>
module attributes {stable_mosaic.version = 11 : i64} {
  func.func @ffn_kernel(%arg0: i32, %arg1: i32, %arg2: i32, %arg3: memref<16x128xbf16, #tpu.memory_space<vmem>>, %arg4: memref<128x128xbf16, #tpu.memory_space<vmem>>, %arg5: memref<1x128xf32, #tpu.memory_space<vmem>>, %arg6: memref<16x128xf32, #tpu.memory_space<vmem>>, %arg7: memref<16x128xf32, #tpu.memory_space<vmem>>) attributes {dimension_semantics = [#tpu.dimension_semantics<parallel>, #tpu.dimension_semantics<parallel>, #tpu.dimension_semantics<arbitrary>], iteration_bounds = array<i64: 1, 1, 1>, scalar_prefetch = 0 : i64, scratch_operands = 1 : i64, tpu.core_type = #tpu.core_type<tc>, window_params = [{transform_indices = @transform_0, window_bounds = array<i64: 16, 128>}, {transform_indices = @transform_1, window_bounds = array<i64: 128, 128>}, {transform_indices = @transform_2, window_bounds = array<i64: 1, 128>}, {transform_indices = @transform_3, window_bounds = array<i64: 16, 128>}]} {
    %c0 = arith.constant 0 : index
    %c0_0 = arith.constant 0 : index
    %0 = vector.load %arg3[%c0, %c0_0] : memref<16x128xbf16, #tpu.memory_space<vmem>>, vector<16x128xbf16>
    %c0_1 = arith.constant 0 : index
    %c0_2 = arith.constant 0 : index
    %1 = vector.load %arg4[%c0_1, %c0_2] : memref<128x128xbf16, #tpu.memory_space<vmem>>, vector<128x128xbf16>
    %cst = arith.constant dense<0.000000e+00> : vector<16x128xf32>
    %2 = tpu.matmul %0, %1, %cst {dimension_numbers = #tpu.dot_dimension_numbers<[1], [0], [0], [1], [0, 0, 1, 1], [], []>} : vector<16x128xbf16>, vector<128x128xbf16>, vector<16x128xf32> -> vector<16x128xf32>
    %c0_i32 = arith.constant 0 : i32
    %3 = arith.cmpi eq, %arg2, %c0_i32 : i32
    %4 = arith.extui %3 : i1 to i32
    %c0_i32_3 = arith.constant 0 : i32
    %5 = arith.cmpi ne, %4, %c0_i32_3 : i32
    scf.if %5 {
      %c0_8 = arith.constant 0 : index
      %c0_9 = arith.constant 0 : index
      %12 = vector.load %arg7[%c0_8, %c0_9] : memref<16x128xf32, #tpu.memory_space<vmem>>, vector<16x128xf32>
      tpu.vector_store %arg7[%c0_8, %c0_9], %2 {strides = array<i32>} : memref<16x128xf32, #tpu.memory_space<vmem>>, vector<16x128xf32>,
    } else {
    }
    %c0_i32_4 = arith.constant 0 : i32
    %6 = arith.cmpi sgt, %arg2, %c0_i32_4 : i32
    %7 = arith.extui %6 : i1 to i32
    %c0_i32_5 = arith.constant 0 : i32
    %8 = arith.cmpi ne, %7, %c0_i32_5 : i32
    scf.if %8 {
      %c0_8 = arith.constant 0 : index
      %c0_9 = arith.constant 0 : index
      %12 = vector.load %arg7[%c0_8, %c0_9] : memref<16x128xf32, #tpu.memory_space<vmem>>, vector<16x128xf32>
      %13 = arith.addf %12, %2 : vector<16x128xf32>
      %c0_10 = arith.constant 0 : index
      %c0_11 = arith.constant 0 : index
      %14 = vector.load %arg7[%c0_10, %c0_11] : memref<16x128xf32, #tpu.memory_space<vmem>>, vector<16x128xf32>
      tpu.vector_store %arg7[%c0_10, %c0_11], %13 {strides = array<i32>} : memref<16x128xf32, #tpu.memory_space<vmem>>, vector<16x128xf32>,
    } else {
    }
    %c0_i32_6 = arith.constant 0 : i32
    %9 = arith.cmpi eq, %arg2, %c0_i32_6 : i32
    %10 = arith.extui %9 : i1 to i32
    %c0_i32_7 = arith.constant 0 : i32
    %11 = arith.cmpi ne, %10, %c0_i32_7 : i32
    scf.if %11 {
      %c0_8 = arith.constant 0 : index
      %c0_9 = arith.constant 0 : index
      %12 = vector.load %arg7[%c0_8, %c0_9] : memref<16x128xf32, #tpu.memory_space<vmem>>, vector<16x128xf32>
      %c0_10 = arith.constant 0 : index
      %c0_11 = arith.constant 0 : index
      %13 = vector.load %arg5[%c0_10, %c0_11] : memref<1x128xf32, #tpu.memory_space<vmem>>, vector<1x128xf32>
      %14 = vector.broadcast %13 : vector<1x128xf32> to vector<16x128xf32>
      %15 = arith.addf %12, %14 : vector<16x128xf32>
      %cst_12 = arith.constant 0.000000e+00 : f32
      %16 = vector.broadcast %cst_12 : f32 to vector<16x128xf32>
      %17 = arith.maximumf %15, %16 : vector<16x128xf32>
      %c0_13 = arith.constant 0 : index
      %c0_14 = arith.constant 0 : index
      %18 = vector.load %arg6[%c0_13, %c0_14] : memref<16x128xf32, #tpu.memory_space<vmem>>, vector<16x128xf32>
      tpu.vector_store %arg6[%c0_13, %c0_14], %17 {strides = array<i32>} : memref<16x128xf32, #tpu.memory_space<vmem>>, vector<16x128xf32>,
    } else {
    }
    return
  }
  func.func @transform_0(%arg0: i32, %arg1: i32, %arg2: i32) -> (i32, i32) {
    %c0_i32 = arith.constant 0 : i32
    return %arg0, %arg2 : i32, i32
  }
  func.func @transform_1(%arg0: i32, %arg1: i32, %arg2: i32) -> (i32, i32) {
    %c0_i32 = arith.constant 0 : i32
    return %arg2, %arg1 : i32, i32
  }
  func.func @transform_2(%arg0: i32, %arg1: i32, %arg2: i32) -> (i32, i32) {
    %c0_i32 = arith.constant 0 : i32
    %c0_i32_0 = arith.constant 0 : i32
    return %c0_i32, %arg1 : i32, i32
  }
  func.func @transform_3(%arg0: i32, %arg1: i32, %arg2: i32) -> (i32, i32) {
    %c0_i32 = arith.constant 0 : i32
    return %arg0, %arg1 : i32, i32
  }
}

</mosaic_0001>

<bundles_post_ra>
// kernel: tpu_custom_call.1
= control target key start
LH: loop header
LB: loop body
LE: loop exit
PB: predicated region body
PF: predicated region fallthrough
CT: control target
= control target key end

     0   :  { %8 = vsyncpa [#allocation4], 0  ;;  %s406_s0 = inlined_call_operand.hbm [shape: bf16[16,128], index: 0, kind: input, shape index: {}]   ;;  %s407_s1 = inlined_call_operand.hbm [shape: bf16[128,128], index: 1, kind: input, shape index: {}]   ;;  %s408_s2 = inlined_call_operand.vmem [shape: f32[1,128], index: 2, kind: input, shape index: {}]   ;;  %s409_s3 = inlined_call_operand.hbm [shape: f32[16,128], index: 3, kind: output, shape index: {}]  }
   0x1   :  { %9 = vsyncpa [#allocation7], 0 }
   0x2   :  { %10 = vsyncpa [#allocation5], 0  ;;  %s338_s12 = smov [#allocation3]   ;;  %s266_s16 = scalar_lea.hbm %s406_s0, 128 }
   0x3   :  { %s16_s13 = sshll.u32 %s338_s12, 4  ;;  %p267_p0 = scmp.ne.s32.totalorder %s406_s0, %s266_s16  ;;  %s17_s13 = int_to_ptr.vmem [resolvable:$true] %s16_s13 }
   0x4   :  { %p270_p1 = scmp.lt.u32.totalorder %s266_s16, %s406_s0 }
   0x6   :  { %p272_p2 = pnand %p270_p1, %p267_p0 }
   0x8   :  { %275 = shalt.err (!%p272_p2)
}
   0x9   :  { %s276_s21 = scalar_lea.vmem %s17_s13, 128  ;;  %p281_p4 = scmp.lt.s32.totalorder %s17_s13, %s17_s13 }
   0xa   :  { %p277_p3 = scmp.ne.s32.totalorder %s17_s13, %s276_s21  ;;  %p282_p5 = scmp.lt.s32.totalorder %s276_s21, %s276_s21 }
   0xc   :  { %p283_p6 = por %p282_p5, %p281_p4 }
   0xe   :  { %p284_p7 = pnand %p283_p6, %p277_p3 }
  0x10   :  { %287 = shalt.err (!%p284_p7)
}
  0x11   :  { %s339_s22 = smov 64   ;;  %s340_s23 = smov 4  }
  0x12   :  { %22 = dma.hbm_to_vmem [thread:$0]  %s406_s0, 128, %s17_s13, [#allocation4], %s339_s22, %s339_s22, %s340_s23  }
  0x13   :  { %s341_s26 = smov [#allocation6]   ;;  %s288_s30 = scalar_lea.hbm %s407_s1, 1024 }
  0x14   :  { %s28_s27 = sshll.u32 %s341_s26, 4  ;;  %p289_p8 = scmp.ne.s32.totalorder %s407_s1, %s288_s30  ;;  %s29_s27 = int_to_ptr.vmem [resolvable:$true] %s28_s27 }
  0x15   :  { %p292_p9 = scmp.lt.u32.totalorder %s288_s30, %s407_s1 }
  0x17   :  { %p294_p10 = pnand %p292_p9, %p289_p8 }
  0x19   :  { %297 = shalt.err (!%p294_p10)
}
  0x1a   :  { %s298_s8 = scalar_lea.vmem %s29_s27, 1024  ;;  %p303_p12 = scmp.lt.s32.totalorder %s29_s27, %s29_s27 }
  0x1b   :  { %p299_p11 = scmp.ne.s32.totalorder %s29_s27, %s298_s8  ;;  %p304_p13 = scmp.lt.s32.totalorder %s298_s8, %s298_s8 }
  0x1d   :  { %p305_p0 = por %p304_p13, %p303_p12 }
  0x1f   :  { %p306_p1 = pnand %p305_p0, %p299_p11 }
  0x21   :  { %309 = shalt.err (!%p306_p1)
}
  0x22   :  { %34 = dma.hbm_to_vmem [thread:$0]  %s407_s1, 1024, %s29_s27, [#allocation7], %s339_s22, %s339_s22, %s340_s23  }
  0x23   :  { %332 = dma.done.wait [#allocation4], 128  }
  0x24   :  { %333 = vsyncadd [#allocation4], 4294967168 }
  0x25   :  { %334 = dma.done.wait [#allocation7], 1024  }
  0x26   :  { %335 = vsyncadd [#allocation7], 4294966272  ;;  %v342_v0 = vmov 0.0   ;;  %vm343_vm0 = vmmov 0   ;;  %v257_v1 = vld [vmem:[#allocation6] sm:$0xff]   ;;  %v258_v2 = vld [vmem:[#allocation6 + $0x8] sm:$0xff]  }
  0x27   :  { %228 = vmatprep.subr.bf16.mxu0 %v342_v0  ;;  %244 = vmatprep.mubr.msk.bf16.mxu0 %vm343_vm0, %v342_v0  ;;  %v259_v3 = vld [vmem:[#allocation6 + $0x10] sm:$0xff]   ;;  %v260_v4 = vld [vmem:[#allocation6 + $0x18] sm:$0xff]   ;;  %v261_v5 = vld [vmem:[#allocation6 + $0x20] sm:$0xff]   ;;  %s344_s11 = smov [#allocation8]  }
  0x28   :  { %229 = vmatpush3.bf16.msra.mxu0 %v257_v1  ;;  %v262_v6 = vld [vmem:[#allocation6 + $0x28] sm:$0xff]   ;;  %v263_v7 = vld [vmem:[#allocation6 + $0x30] sm:$0xff]   ;;  %v264_v8 = vld [vmem:[#allocation6 + $0x38] sm:$0xff]   ;;  %s196_s12 = sshll.u32 %s344_s11, 4  ;;  %s197_s12 = int_to_ptr.vmem [resolvable:$true] %s196_s12 }
  0x29   :  { %230 = vmatprep.subr.bf16.mxu0 %v342_v0  ;;  %v265_v9 = vld [vmem:[#allocation3] sm:$0xff]   ;;  %s310_s13 = scalar_lea.vmem %s197_s12, 256  ;;  %p315_p3 = scmp.lt.s32.totalorder %s197_s12, %s197_s12 }
  0x2a   :  { %v218_v10 = vld [vmem:[%s408_s2] ss:$0 sm:$0xff]  ;;  %p311_p2 = scmp.ne.s32.totalorder %s197_s12, %s310_s13  ;;  %p316_p4 = scmp.lt.s32.totalorder %s310_s13, %s310_s13 }
  0x2c   :  { %231 = vmatpush3.bf16.msra.mxu0 %v258_v2  ;;  %p317_p5 = por %p316_p4, %p315_p3 }
  0x2d   :  { %232 = vmatprep.subr.bf16.mxu0 %v342_v0 }
  0x2e   :  { %p318_p6 = pnand %p317_p5, %p311_p2 }
  0x30   :  { %233 = vmatpush3.bf16.msra.mxu0 %v259_v3 }
  0x31   :  { %234 = vmatprep.subr.bf16.mxu0 %v342_v0 }
  0x34   :  { %235 = vmatpush3.bf16.msra.mxu0 %v260_v4 }
  0x35   :  { %236 = vmatprep.subr.bf16.mxu0 %v342_v0 }
  0x38   :  { %237 = vmatpush3.bf16.msra.mxu0 %v261_v5 }
  0x39   :  { %238 = vmatprep.subr.bf16.mxu0 %v342_v0 }
  0x3c   :  { %239 = vmatpush3.bf16.msra.mxu0 %v262_v6 }
  0x3d   :  { %240 = vmatprep.subr.bf16.mxu0 %v342_v0 }
  0x40   :  { %241 = vmatpush3.bf16.msra.mxu0 %v263_v7 }
  0x41   :  { %242 = vmatprep.subr.bf16.mxu0 %v342_v0 }
  0x44   :  { %243 = vmatpush3.bf16.msra.mxu0 %v264_v8 }
  0x47   :  { %245 = vmatmul.mubr.bf16.vlgmr.msra.gmra.mrb[0].mxu0 %v265_v9 }
 0x11a   :  { %v150_v11 = vpop.f32.mrb[0].mxu0 }
 0x11b   :  { %v185_v12 = vadd.f32 %v218_v10, %v150_v11  ;;  %v246_v13 = vpop.f32.mrb[1].mxu0 }
 0x11c   :  { %v153_v14 = vpop.f32.mrb[2].mxu0 }
 0x11d   :  { %v187_v15 = vmax.f32 %v185_v12, 0.0  ;;  %v186_v16 = vadd.f32 %v218_v10, %v153_v14  ;;  %v247_v17 = vpop.f32.mrb[3].mxu0 }
 0x11f   :  { %189 = vst [vmem:[#allocation8] sm:$0xff] %v187_v15  ;;  %v188_v18 = vmax.f32 %v186_v16, 0.0 }
 0x121   :  { %190 = vst [vmem:[#allocation8 + $0x8] sm:$0xff] %v188_v18 }
 0x122   :  { %321 = shalt.err (!%p318_p6)
}
 0x123   :  { %s322_s15 = scalar_lea.hbm %s409_s3, 256 }
 0x124   :  { %p323_p7 = scmp.ne.s32.totalorder %s409_s3, %s322_s15  ;;  %p326_p8 = scmp.lt.u32.totalorder %s322_s15, %s409_s3 }
 0x126   :  { %p328_p9 = pnand %p326_p8, %p323_p7 }
 0x128   :  { %331 = shalt.err (!%p328_p9)
}
 0x129   :  { %s345_s20 = smov 128   ;;  %s346_s21 = smov 8  }
 0x12a   :  { %202 = dma.vmem_to_hbm [thread:$0]  %s197_s12, 256, %s409_s3, [#allocation5], %s345_s20, %s345_s20, %s346_s21  }
 0x12b   :  { %336 = dma.done.wait [#allocation5], 256  }
 0x12c   :  { %337 = vsyncadd [#allocation5], 4294967040 }
 0x12d   :  { %206 = vsyncpa [#allocation4], 1 }
 0x12e   :  { %207 = vsyncpa [#allocation7], 1 }
 0x12f   :  { %208 = vsyncpa [#allocation5], 1 }

</bundles_post_ra>
